<compile_context>
chip_gen: v7x
topology: tpu7x:2x2x1
jax: 0.10.0
libtpu: 0.0.40
codegen_flags: <defaults>
</compile_context>

<pallas_src>
import jax
import jax.numpy as jnp
from jax.experimental import pallas as pl
from jax.experimental.pallas import tpu as pltpu


def _make_kernel(num_preds, num_classes, tile_rows, acc_rows, total_rows,
                 tiles_per_split, need_mask):
    """Kernel for static (P, C, TR, ...) configuration."""
    n_chunks = tile_rows // acc_rows    # TR is either <=8 (1 chunk) or a multiple of 8

    def kernel(tgt_ref, *args):
        pred_refs = args[:num_preds]            # each: (C, TR, 128) logits
        out_ref = args[num_preds]                # (P, 128) per-lane loss sums
        acc_ref = args[num_preds + 1]            # VMEM scratch (P, acc_rows, 128) f32

        i = pl.program_id(2)

        @pl.when(i == 0)
        def _init():
            acc_ref[...] = jnp.zeros_like(acc_ref)

        if need_mask:
            # Un-clamped tile index (clamped only in the index_map, so duplicated
            # tail tiles read valid memory but contribute zero here).
            tile_idx = pl.program_id(1) * tiles_per_split + i

        partials = [None] * num_preds
        for k in range(n_chunks):
            r0 = k * acc_rows
            t_chunk = tgt_ref[r0:r0 + acc_rows, :]            # (acc_rows, 128) int32
            # Hoisted: one set of class-match masks per chunk, reused across P.
            # NOTE: out-of-range target ids silently contribute tgt_logit = 0
            # (PyTorch CrossEntropyLoss would raise); targets assumed in [0, C).
            masks = [t_chunk == c for c in range(num_classes)]
            if need_mask:
                row_ids = jax.lax.broadcasted_iota(jnp.int32, (acc_rows, 128), 0)
                valid = (row_ids + (tile_idx * tile_rows + r0)) < total_rows

            for p in range(num_preds):
                # Lane-dense per-class chunk slabs, upcast in-kernel (bf16 ok).
                x = [pred_refs[p][c, r0:r0 + acc_rows, :].astype(jnp.float32)
                     for c in range(num_classes)]

                # Unrolled class reduction -- pure VPU/EUP, no cross-lane reduce.
                m = x[0]
                for c in range(1, num_classes):
                    m = jnp.maximum(m, x[c])
                s = jnp.exp(x[0] - m)
                tgt_logit = jnp.where(masks[0], x[0], 0.0)
                for c in range(1, num_classes):
                    s = s + jnp.exp(x[c] - m)
                    tgt_logit = tgt_logit + jnp.where(masks[c], x[c], 0.0)

                ce = m + jnp.log(s) - tgt_logit                # per-element CE
                if need_mask:
                    ce = jnp.where(valid, ce, 0.0)
                partials[p] = ce if partials[p] is None else partials[p] + ce

        # One small accumulator update per prediction per grid step.
        for p in range(num_preds):
            acc_ref[p] = acc_ref[p] + partials[p]

        @pl.when(i == pl.num_programs(2) - 1)
        def _finalize():
            for p in range(num_preds):
                out_ref[p, :] = jnp.sum(acc_ref[p], axis=0)    # sublane reduce, once

    return kernel


def _vmem_config():
    """(tiling budget, vmem_limit_bytes) chosen per part's physical VMEM."""
    try:
        cap = pltpu.get_tpu_info().vmem_capacity_bytes
    except Exception:
        cap = None
    if cap is None:
        cap = 64 << 20                       # conservative: assume v7x (64 MiB/TC)
    if cap >= (96 << 20):                    # 128 MiB parts (v5e / v6e): go bigger
        return 64 << 20, 96 << 20
    return 24 << 20, 44 << 20                # 64 MiB parts (v7x): stay well under


def _pick_tile_rows(rows, num_preds, num_classes, itemsize, budget_bytes):
    """Row tile (sublane rows of 128 lanes): dtype-aware VMEM fit + pipelining cap."""
    # Bytes per tile row: double-buffered logits for all P preds (real dtype)
    # + double-buffered int32 target.  (f32 intermediates are chunk-sized vregs,
    # the accumulator is a fixed (P, 8, 128) scratch -- both negligible.)
    per_row = 128 * (2 * num_preds * num_classes * itemsize + 2 * 4)
    cap_mem = max(8, budget_bytes // per_row)
    if rows <= 8:
        return rows                          # full-dim block is the only legal tile
    cap_pipe = max(8, rows // 4)             # keep >= ~4 tiles so DMA overlaps compute
    tr = min(rows, cap_mem, cap_pipe, 512)   # 512 rows already ~85% of HBM roofline
    tr -= tr % 8
    return max(tr, 8)


def my_side_loss(predictions, target):
    """predictions: list of (N, C, H, W) logits; target: (N, H, W) int class ids."""
    P = len(predictions)
    N, C, H, W = predictions[0].shape
    for p in predictions:
        assert p.shape == (N, C, H, W), "all side predictions must match target size"
    assert target.shape == (N, H, W)
    S = H * W
    # TODO(synk): H*W not a multiple of 128 would need lane-axis masking / padding.
    assert S % 128 == 0, "spatial size H*W must be a multiple of 128"
    R = S // 128

    budget, vmem_limit = _vmem_config()
    itemsize = predictions[0].dtype.itemsize
    TR = _pick_tile_rows(R, P, C, itemsize, budget)
    T_total = (R + TR - 1) // TR
    SPLIT = 2 if T_total >= 2 else 1         # 2-way row split keeps both v7x TCs busy
    T_PER_SPLIT = (T_total + SPLIT - 1) // SPLIT
    ACC_ROWS = min(TR, 8)
    need_mask = (R % TR != 0) or (SPLIT * T_PER_SPLIT != T_total)

    # Free reshapes of the native NCHW memory layout (no transpose, no stack).
    preds = [p.reshape(N, C, R, 128) for p in predictions]
    tgt = target.reshape(N, R, 128).astype(jnp.int32)

    def tile_index(h, i):
        # Clamp so duplicated tail tiles still read in-bounds memory; their
        # contribution is zeroed in-kernel via the row-validity mask.
        return jnp.minimum(h * T_PER_SPLIT + i, T_total - 1)

    # TODO(synk): on v5e, if the trace shows exposed DMA, add
    # pipeline_mode=pl.Buffered(3) on the prediction BlockSpecs.
    pred_spec = pl.BlockSpec((pl.Squeezed(), C, TR, 128),
                             lambda n, h, i: (n, 0, tile_index(h, i), 0))
    tgt_spec = pl.BlockSpec((pl.Squeezed(), TR, 128),
                            lambda n, h, i: (n, tile_index(h, i), 0))
    out_spec = pl.BlockSpec((pl.Squeezed(), pl.Squeezed(), P, 128),
                            lambda n, h, i: (n, h, 0, 0))

    lane_sums = pl.pallas_call(
        _make_kernel(P, C, TR, ACC_ROWS, R, T_PER_SPLIT, need_mask),
        out_shape=jax.ShapeDtypeStruct((N, SPLIT, P, 128), jnp.float32),
        grid_spec=pltpu.PrefetchScalarGridSpec(
            num_scalar_prefetch=0,
            grid=(N, SPLIT, T_PER_SPLIT),
            in_specs=[tgt_spec] + [pred_spec] * P,
            out_specs=out_spec,
            scratch_shapes=[pltpu.VMEM((P, ACC_ROWS, 128), jnp.float32)],
        ),
        compiler_params=pltpu.CompilerParams(
            dimension_semantics=("parallel", "parallel", "arbitrary"),
            vmem_limit_bytes=vmem_limit,
        ),
    )(tgt, *preds)

    # CrossEntropyLoss(reduce=True) == mean over all N*H*W positions;
    # side-loss weights are 1, 2, 4, ... (w *= 2 per prediction).
    per_pred = jnp.sum(lane_sums, axis=(0, 1, 3))              # (P,)
    weights = 2.0 ** jnp.arange(P, dtype=jnp.float32)
    return jnp.sum(weights * (per_pred / (N * S)))


def my_side_loss_ref(predictions, target):
    """Pure-JAX reference for verification."""
    total = 0.0
    w = 1.0
    for p in predictions:
        x = jnp.transpose(p, (0, 2, 3, 1)).astype(jnp.float32)   # (N,H,W,C)
        lse = jax.scipy.special.logsumexp(x, axis=-1)
        tgt_logit = jnp.take_along_axis(x, target[..., None], axis=-1)[..., 0]
        total = total + w * jnp.mean(lse - tgt_logit)
        w *= 2.0
    return total


if __name__ == "__main__":
    key = jax.random.PRNGKey(0)

    # --- Test 1: module-sized case (N=2, C=4, 16x16, 3 side predictions) ---
    N, C, H, W, P = 2, 4, 16, 16, 3
    kp, kt, key = jax.random.split(key, 3)
    pred_keys = jax.random.split(kp, P)
    predictions = [jax.random.normal(k, (N, C, H, W), dtype=jnp.float32)
                   for k in pred_keys]
    target = jax.random.randint(kt, (N, H, W), 0, C, dtype=jnp.int32)
    loss = jax.block_until_ready(my_side_loss(predictions, target))
    ref = my_side_loss_ref(predictions, target)
    assert jnp.allclose(loss, ref, rtol=1e-5, atol=1e-5), (loss, ref)

    # --- Test 2: exercises the 2-way row split, chunked compute and the
    #             tail-tile validity mask (R = 20 rows, TR = 8). ---
    N2, C2, H2, W2, P2 = 1, 4, 16, 160, 2
    kp2, kt2, key = jax.random.split(key, 3)
    pred_keys2 = jax.random.split(kp2, P2)
    predictions2 = [jax.random.normal(k, (N2, C2, H2, W2), dtype=jnp.float32)
                    for k in pred_keys2]
    target2 = jax.random.randint(kt2, (N2, H2, W2), 0, C2, dtype=jnp.int32)
    loss2 = jax.block_until_ready(my_side_loss(predictions2, target2))
    ref2 = my_side_loss_ref(predictions2, target2)
    assert jnp.allclose(loss2, ref2, rtol=1e-5, atol=1e-5), (loss2, ref2)

    print("KERNEL_OK")
</pallas_src>

<mosaic_0001>
module attributes {stable_mosaic.version = 11 : i64} {
  func.func @kernel(%arg0: i32, %arg1: i32, %arg2: i32, %arg3: memref<1x2x128xi32, #tpu.memory_space<vmem>>, %arg4: memref<1x4x2x128xf32, #tpu.memory_space<vmem>>, %arg5: memref<1x4x2x128xf32, #tpu.memory_space<vmem>>, %arg6: memref<1x4x2x128xf32, #tpu.memory_space<vmem>>, %arg7: memref<1x1x3x128xf32, #tpu.memory_space<vmem>>, %arg8: memref<3x2x128xf32, #tpu.memory_space<vmem>>) attributes {dimension_semantics = [#tpu.dimension_semantics<parallel>, #tpu.dimension_semantics<parallel>, #tpu.dimension_semantics<arbitrary>], iteration_bounds = array<i64: 2, 1, 1>, scalar_prefetch = 0 : i64, scratch_operands = 1 : i64, tpu.core_type = #tpu.core_type<tc>, window_params = [{transform_indices = @transform_0, window_bounds = array<i64: 1, 2, 128>}, {transform_indices = @transform_1, window_bounds = array<i64: 1, 4, 2, 128>}, {transform_indices = @transform_2, window_bounds = array<i64: 1, 4, 2, 128>}, {transform_indices = @transform_3, window_bounds = array<i64: 1, 4, 2, 128>}, {transform_indices = @transform_4, window_bounds = array<i64: 1, 1, 3, 128>}]} {
    %c0_i32 = arith.constant 0 : i32
    %0 = arith.cmpi eq, %arg2, %c0_i32 : i32
    %1 = arith.extui %0 : i1 to i32
    %c0_i32_0 = arith.constant 0 : i32
    %2 = arith.cmpi ne, %1, %c0_i32_0 : i32
    scf.if %2 {
      %cst_80 = arith.constant 0.000000e+00 : f32
      %142 = vector.broadcast %cst_80 : f32 to vector<3x2x128xf32>
      %c0_81 = arith.constant 0 : index
      %c0_82 = arith.constant 0 : index
      %c0_83 = arith.constant 0 : index
      %143 = vector.load %arg8[%c0_81, %c0_82, %c0_83] : memref<3x2x128xf32, #tpu.memory_space<vmem>>, vector<3x2x128xf32>
      tpu.vector_store %arg8[%c0_81, %c0_82, %c0_83], %142 {strides = array<i32>} : memref<3x2x128xf32, #tpu.memory_space<vmem>>, vector<3x2x128xf32>,
    } else {
    }
    %c0 = arith.constant 0 : index
    %c0_1 = arith.constant 0 : index
    %c0_2 = arith.constant 0 : index
    %3 = vector.load %arg3[%c0, %c0_1, %c0_2] : memref<1x2x128xi32, #tpu.memory_space<vmem>>, vector<1x2x128xi32>
    %4 = vector.shape_cast %3 : vector<1x2x128xi32> to vector<2x128xi32>
    %c0_i32_3 = arith.constant 0 : i32
    %5 = vector.broadcast %c0_i32_3 : i32 to vector<2x128xi32>
    %6 = arith.cmpi eq, %4, %5 : vector<2x128xi32>
    %c1_i32 = arith.constant 1 : i32
    %7 = vector.broadcast %c1_i32 : i32 to vector<2x128xi32>
    %8 = arith.cmpi eq, %4, %7 : vector<2x128xi32>
    %c2_i32 = arith.constant 2 : i32
    %9 = vector.broadcast %c2_i32 : i32 to vector<2x128xi32>
    %10 = arith.cmpi eq, %4, %9 : vector<2x128xi32>
    %c3_i32 = arith.constant 3 : i32
    %11 = vector.broadcast %c3_i32 : i32 to vector<2x128xi32>
    %12 = arith.cmpi eq, %4, %11 : vector<2x128xi32>
    %c0_4 = arith.constant 0 : index
    %c0_5 = arith.constant 0 : index
    %c0_6 = arith.constant 0 : index
    %c0_7 = arith.constant 0 : index
    %13 = vector.load %arg4[%c0_4, %c0_5, %c0_6, %c0_7] : memref<1x4x2x128xf32, #tpu.memory_space<vmem>>, vector<1x1x2x128xf32>
    %14 = vector.shape_cast %13 : vector<1x1x2x128xf32> to vector<2x128xf32>
    %c0_8 = arith.constant 0 : index
    %c1 = arith.constant 1 : index
    %c0_9 = arith.constant 0 : index
    %c0_10 = arith.constant 0 : index
    %15 = vector.load %arg4[%c0_8, %c1, %c0_9, %c0_10] : memref<1x4x2x128xf32, #tpu.memory_space<vmem>>, vector<1x1x2x128xf32>
    %16 = vector.shape_cast %15 : vector<1x1x2x128xf32> to vector<2x128xf32>
    %c0_11 = arith.constant 0 : index
    %c2 = arith.constant 2 : index
    %c0_12 = arith.constant 0 : index
    %c0_13 = arith.constant 0 : index
    %17 = vector.load %arg4[%c0_11, %c2, %c0_12, %c0_13] : memref<1x4x2x128xf32, #tpu.memory_space<vmem>>, vector<1x1x2x128xf32>
    %18 = vector.shape_cast %17 : vector<1x1x2x128xf32> to vector<2x128xf32>
    %c0_14 = arith.constant 0 : index
    %c3 = arith.constant 3 : index
    %c0_15 = arith.constant 0 : index
    %c0_16 = arith.constant 0 : index
    %19 = vector.load %arg4[%c0_14, %c3, %c0_15, %c0_16] : memref<1x4x2x128xf32, #tpu.memory_space<vmem>>, vector<1x1x2x128xf32>
    %20 = vector.shape_cast %19 : vector<1x1x2x128xf32> to vector<2x128xf32>
    %21 = arith.maximumf %14, %16 : vector<2x128xf32>
    %22 = arith.maximumf %21, %18 : vector<2x128xf32>
    %23 = arith.maximumf %22, %20 : vector<2x128xf32>
    %24 = arith.subf %14, %23 : vector<2x128xf32>
    %25 = math.exp %24 : vector<2x128xf32>
    %cst = arith.constant 0.000000e+00 : f32
    %26 = vector.broadcast %cst : f32 to vector<2x128xf32>
    %27 = arith.select %6, %14, %26 : vector<2x128xi1>, vector<2x128xf32>
    %28 = arith.subf %16, %23 : vector<2x128xf32>
    %29 = math.exp %28 : vector<2x128xf32>
    %30 = arith.addf %25, %29 : vector<2x128xf32>
    %cst_17 = arith.constant 0.000000e+00 : f32
    %31 = vector.broadcast %cst_17 : f32 to vector<2x128xf32>
    %32 = arith.select %8, %16, %31 : vector<2x128xi1>, vector<2x128xf32>
    %33 = arith.addf %27, %32 : vector<2x128xf32>
    %34 = arith.subf %18, %23 : vector<2x128xf32>
    %35 = math.exp %34 : vector<2x128xf32>
    %36 = arith.addf %30, %35 : vector<2x128xf32>
    %cst_18 = arith.constant 0.000000e+00 : f32
    %37 = vector.broadcast %cst_18 : f32 to vector<2x128xf32>
    %38 = arith.select %10, %18, %37 : vector<2x128xi1>, vector<2x128xf32>
    %39 = arith.addf %33, %38 : vector<2x128xf32>
    %40 = arith.subf %20, %23 : vector<2x128xf32>
    %41 = math.exp %40 : vector<2x128xf32>
    %42 = arith.addf %36, %41 : vector<2x128xf32>
    %cst_19 = arith.constant 0.000000e+00 : f32
    %43 = vector.broadcast %cst_19 : f32 to vector<2x128xf32>
    %44 = arith.select %12, %20, %43 : vector<2x128xi1>, vector<2x128xf32>
    %45 = arith.addf %39, %44 : vector<2x128xf32>
    %46 = math.log %42 : vector<2x128xf32>
    %47 = arith.addf %23, %46 : vector<2x128xf32>
    %48 = arith.subf %47, %45 : vector<2x128xf32>
    %c0_20 = arith.constant 0 : index
    %c0_21 = arith.constant 0 : index
    %c0_22 = arith.constant 0 : index
    %c0_23 = arith.constant 0 : index
    %49 = vector.load %arg5[%c0_20, %c0_21, %c0_22, %c0_23] : memref<1x4x2x128xf32, #tpu.memory_space<vmem>>, vector<1x1x2x128xf32>
    %50 = vector.shape_cast %49 : vector<1x1x2x128xf32> to vector<2x128xf32>
    %c0_24 = arith.constant 0 : index
    %c1_25 = arith.constant 1 : index
    %c0_26 = arith.constant 0 : index
    %c0_27 = arith.constant 0 : index
    %51 = vector.load %arg5[%c0_24, %c1_25, %c0_26, %c0_27] : memref<1x4x2x128xf32, #tpu.memory_space<vmem>>, vector<1x1x2x128xf32>
    %52 = vector.shape_cast %51 : vector<1x1x2x128xf32> to vector<2x128xf32>
    %c0_28 = arith.constant 0 : index
    %c2_29 = arith.constant 2 : index
    %c0_30 = arith.constant 0 : index
    %c0_31 = arith.constant 0 : index
    %53 = vector.load %arg5[%c0_28, %c2_29, %c0_30, %c0_31] : memref<1x4x2x128xf32, #tpu.memory_space<vmem>>, vector<1x1x2x128xf32>
    %54 = vector.shape_cast %53 : vector<1x1x2x128xf32> to vector<2x128xf32>
    %c0_32 = arith.constant 0 : index
    %c3_33 = arith.constant 3 : index
    %c0_34 = arith.constant 0 : index
    %c0_35 = arith.constant 0 : index
    %55 = vector.load %arg5[%c0_32, %c3_33, %c0_34, %c0_35] : memref<1x4x2x128xf32, #tpu.memory_space<vmem>>, vector<1x1x2x128xf32>
    %56 = vector.shape_cast %55 : vector<1x1x2x128xf32> to vector<2x128xf32>
    %57 = arith.maximumf %50, %52 : vector<2x128xf32>
    %58 = arith.maximumf %57, %54 : vector<2x128xf32>
    %59 = arith.maximumf %58, %56 : vector<2x128xf32>
    %60 = arith.subf %50, %59 : vector<2x128xf32>
    %61 = math.exp %60 : vector<2x128xf32>
    %cst_36 = arith.constant 0.000000e+00 : f32
    %62 = vector.broadcast %cst_36 : f32 to vector<2x128xf32>
    %63 = arith.select %6, %50, %62 : vector<2x128xi1>, vector<2x128xf32>
    %64 = arith.subf %52, %59 : vector<2x128xf32>
    %65 = math.exp %64 : vector<2x128xf32>
    %66 = arith.addf %61, %65 : vector<2x128xf32>
    %cst_37 = arith.constant 0.000000e+00 : f32
    %67 = vector.broadcast %cst_37 : f32 to vector<2x128xf32>
    %68 = arith.select %8, %52, %67 : vector<2x128xi1>, vector<2x128xf32>
    %69 = arith.addf %63, %68 : vector<2x128xf32>
    %70 = arith.subf %54, %59 : vector<2x128xf32>
    %71 = math.exp %70 : vector<2x128xf32>
    %72 = arith.addf %66, %71 : vector<2x128xf32>
    %cst_38 = arith.constant 0.000000e+00 : f32
    %73 = vector.broadcast %cst_38 : f32 to vector<2x128xf32>
    %74 = arith.select %10, %54, %73 : vector<2x128xi1>, vector<2x128xf32>
    %75 = arith.addf %69, %74 : vector<2x128xf32>
    %76 = arith.subf %56, %59 : vector<2x128xf32>
    %77 = math.exp %76 : vector<2x128xf32>
    %78 = arith.addf %72, %77 : vector<2x128xf32>
    %cst_39 = arith.constant 0.000000e+00 : f32
    %79 = vector.broadcast %cst_39 : f32 to vector<2x128xf32>
    %80 = arith.select %12, %56, %79 : vector<2x128xi1>, vector<2x128xf32>
    %81 = arith.addf %75, %80 : vector<2x128xf32>
    %82 = math.log %78 : vector<2x128xf32>
    %83 = arith.addf %59, %82 : vector<2x128xf32>
    %84 = arith.subf %83, %81 : vector<2x128xf32>
    %c0_40 = arith.constant 0 : index
    %c0_41 = arith.constant 0 : index
    %c0_42 = arith.constant 0 : index
    %c0_43 = arith.constant 0 : index
    %85 = vector.load %arg6[%c0_40, %c0_41, %c0_42, %c0_43] : memref<1x4x2x128xf32, #tpu.memory_space<vmem>>, vector<1x1x2x128xf32>
    %86 = vector.shape_cast %85 : vector<1x1x2x128xf32> to vector<2x128xf32>
    %c0_44 = arith.constant 0 : index
    %c1_45 = arith.constant 1 : index
    %c0_46 = arith.constant 0 : index
    %c0_47 = arith.constant 0 : index
    %87 = vector.load %arg6[%c0_44, %c1_45, %c0_46, %c0_47] : memref<1x4x2x128xf32, #tpu.memory_space<vmem>>, vector<1x1x2x128xf32>
    %88 = vector.shape_cast %87 : vector<1x1x2x128xf32> to vector<2x128xf32>
    %c0_48 = arith.constant 0 : index
    %c2_49 = arith.constant 2 : index
    %c0_50 = arith.constant 0 : index
    %c0_51 = arith.constant 0 : index
    %89 = vector.load %arg6[%c0_48, %c2_49, %c0_50, %c0_51] : memref<1x4x2x128xf32, #tpu.memory_space<vmem>>, vector<1x1x2x128xf32>
    %90 = vector.shape_cast %89 : vector<1x1x2x128xf32> to vector<2x128xf32>
    %c0_52 = arith.constant 0 : index
    %c3_53 = arith.constant 3 : index
    %c0_54 = arith.constant 0 : index
    %c0_55 = arith.constant 0 : index
    %91 = vector.load %arg6[%c0_52, %c3_53, %c0_54, %c0_55] : memref<1x4x2x128xf32, #tpu.memory_space<vmem>>, vector<1x1x2x128xf32>
    %92 = vector.shape_cast %91 : vector<1x1x2x128xf32> to vector<2x128xf32>
    %93 = arith.maximumf %86, %88 : vector<2x128xf32>
    %94 = arith.maximumf %93, %90 : vector<2x128xf32>
    %95 = arith.maximumf %94, %92 : vector<2x128xf32>
    %96 = arith.subf %86, %95 : vector<2x128xf32>
    %97 = math.exp %96 : vector<2x128xf32>
    %cst_56 = arith.constant 0.000000e+00 : f32
    %98 = vector.broadcast %cst_56 : f32 to vector<2x128xf32>
    %99 = arith.select %6, %86, %98 : vector<2x128xi1>, vector<2x128xf32>
    %100 = arith.subf %88, %95 : vector<2x128xf32>
    %101 = math.exp %100 : vector<2x128xf32>
    %102 = arith.addf %97, %101 : vector<2x128xf32>
    %cst_57 = arith.constant 0.000000e+00 : f32
    %103 = vector.broadcast %cst_57 : f32 to vector<2x128xf32>
    %104 = arith.select %8, %88, %103 : vector<2x128xi1>, vector<2x128xf32>
    %105 = arith.addf %99, %104 : vector<2x128xf32>
    %106 = arith.subf %90, %95 : vector<2x128xf32>
    %107 = math.exp %106 : vector<2x128xf32>
    %108 = arith.addf %102, %107 : vector<2x128xf32>
    %cst_58 = arith.constant 0.000000e+00 : f32
    %109 = vector.broadcast %cst_58 : f32 to vector<2x128xf32>
    %110 = arith.select %10, %90, %109 : vector<2x128xi1>, vector<2x128xf32>
    %111 = arith.addf %105, %110 : vector<2x128xf32>
    %112 = arith.subf %92, %95 : vector<2x128xf32>
    %113 = math.exp %112 : vector<2x128xf32>
    %114 = arith.addf %108, %113 : vector<2x128xf32>
    %cst_59 = arith.constant 0.000000e+00 : f32
    %115 = vector.broadcast %cst_59 : f32 to vector<2x128xf32>
    %116 = arith.select %12, %92, %115 : vector<2x128xi1>, vector<2x128xf32>
    %117 = arith.addf %111, %116 : vector<2x128xf32>
    %118 = math.log %114 : vector<2x128xf32>
    %119 = arith.addf %95, %118 : vector<2x128xf32>
    %120 = arith.subf %119, %117 : vector<2x128xf32>
    %c0_60 = arith.constant 0 : index
    %c0_61 = arith.constant 0 : index
    %c0_62 = arith.constant 0 : index
    %121 = vector.load %arg8[%c0_60, %c0_61, %c0_62] : memref<3x2x128xf32, #tpu.memory_space<vmem>>, vector<1x2x128xf32>
    %122 = vector.shape_cast %121 : vector<1x2x128xf32> to vector<2x128xf32>
    %123 = arith.addf %122, %48 : vector<2x128xf32>
    %c0_63 = arith.constant 0 : index
    %c0_64 = arith.constant 0 : index
    %c0_65 = arith.constant 0 : index
    %124 = vector.load %arg8[%c0_63, %c0_64, %c0_65] : memref<3x2x128xf32, #tpu.memory_space<vmem>>, vector<1x2x128xf32>
    %125 = vector.shape_cast %124 : vector<1x2x128xf32> to vector<2x128xf32>
    %126 = vector.shape_cast %123 : vector<2x128xf32> to vector<1x2x128xf32>
    tpu.vector_store %arg8[%c0_63, %c0_64, %c0_65], %126 {strides = array<i32>} : memref<3x2x128xf32, #tpu.memory_space<vmem>>, vector<1x2x128xf32>,
    %c1_66 = arith.constant 1 : index
    %c0_67 = arith.constant 0 : index
    %c0_68 = arith.constant 0 : index
    %127 = vector.load %arg8[%c1_66, %c0_67, %c0_68] : memref<3x2x128xf32, #tpu.memory_space<vmem>>, vector<1x2x128xf32>
    %128 = vector.shape_cast %127 : vector<1x2x128xf32> to vector<2x128xf32>
    %129 = arith.addf %128, %84 : vector<2x128xf32>
    %c1_69 = arith.constant 1 : index
    %c0_70 = arith.constant 0 : index
    %c0_71 = arith.constant 0 : index
    %130 = vector.load %arg8[%c1_69, %c0_70, %c0_71] : memref<3x2x128xf32, #tpu.memory_space<vmem>>, vector<1x2x128xf32>
    %131 = vector.shape_cast %130 : vector<1x2x128xf32> to vector<2x128xf32>
    %132 = vector.shape_cast %129 : vector<2x128xf32> to vector<1x2x128xf32>
    tpu.vector_store %arg8[%c1_69, %c0_70, %c0_71], %132 {strides = array<i32>} : memref<3x2x128xf32, #tpu.memory_space<vmem>>, vector<1x2x128xf32>,
    %c2_72 = arith.constant 2 : index
    %c0_73 = arith.constant 0 : index
    %c0_74 = arith.constant 0 : index
    %133 = vector.load %arg8[%c2_72, %c0_73, %c0_74] : memref<3x2x128xf32, #tpu.memory_space<vmem>>, vector<1x2x128xf32>
    %134 = vector.shape_cast %133 : vector<1x2x128xf32> to vector<2x128xf32>
    %135 = arith.addf %134, %120 : vector<2x128xf32>
    %c2_75 = arith.constant 2 : index
    %c0_76 = arith.constant 0 : index
    %c0_77 = arith.constant 0 : index
    %136 = vector.load %arg8[%c2_75, %c0_76, %c0_77] : memref<3x2x128xf32, #tpu.memory_space<vmem>>, vector<1x2x128xf32>
    %137 = vector.shape_cast %136 : vector<1x2x128xf32> to vector<2x128xf32>
    %138 = vector.shape_cast %135 : vector<2x128xf32> to vector<1x2x128xf32>
    tpu.vector_store %arg8[%c2_75, %c0_76, %c0_77], %138 {strides = array<i32>} : memref<3x2x128xf32, #tpu.memory_space<vmem>>, vector<1x2x128xf32>,
    %c0_i32_78 = arith.constant 0 : i32
    %139 = arith.cmpi eq, %arg2, %c0_i32_78 : i32
    %140 = arith.extui %139 : i1 to i32
    %c0_i32_79 = arith.constant 0 : i32
    %141 = arith.cmpi ne, %140, %c0_i32_79 : i32
    scf.if %141 {
      %c0_80 = arith.constant 0 : index
      %c0_81 = arith.constant 0 : index
      %c0_82 = arith.constant 0 : index
      %142 = vector.load %arg8[%c0_80, %c0_81, %c0_82] : memref<3x2x128xf32, #tpu.memory_space<vmem>>, vector<1x2x128xf32>
      %143 = vector.shape_cast %142 : vector<1x2x128xf32> to vector<2x128xf32>
      %cst_83 = arith.constant dense<0.000000e+00> : vector<128xf32>
      %144 = vector.multi_reduction <add>, %143, %cst_83 [0] : vector<2x128xf32> to vector<128xf32>
      %c0_84 = arith.constant 0 : index
      %c0_85 = arith.constant 0 : index
      %c0_86 = arith.constant 0 : index
      %c0_87 = arith.constant 0 : index
      %145 = vector.load %arg7[%c0_84, %c0_85, %c0_86, %c0_87] : memref<1x1x3x128xf32, #tpu.memory_space<vmem>>, vector<1x1x1x128xf32>
      %146 = vector.shape_cast %145 : vector<1x1x1x128xf32> to vector<128xf32>
      %147 = vector.shape_cast %144 : vector<128xf32> to vector<1x1x1x128xf32>
      tpu.vector_store %arg7[%c0_84, %c0_85, %c0_86, %c0_87], %147 {strides = array<i32>} : memref<1x1x3x128xf32, #tpu.memory_space<vmem>>, vector<1x1x1x128xf32>,
      %c1_88 = arith.constant 1 : index
      %c0_89 = arith.constant 0 : index
      %c0_90 = arith.constant 0 : index
      %148 = vector.load %arg8[%c1_88, %c0_89, %c0_90] : memref<3x2x128xf32, #tpu.memory_space<vmem>>, vector<1x2x128xf32>
      %149 = vector.shape_cast %148 : vector<1x2x128xf32> to vector<2x128xf32>
      %cst_91 = arith.constant dense<0.000000e+00> : vector<128xf32>
      %150 = vector.multi_reduction <add>, %149, %cst_91 [0] : vector<2x128xf32> to vector<128xf32>
      %c0_92 = arith.constant 0 : index
      %c0_93 = arith.constant 0 : index
      %c1_94 = arith.constant 1 : index
      %c0_95 = arith.constant 0 : index
      %151 = vector.load %arg7[%c0_92, %c0_93, %c1_94, %c0_95] : memref<1x1x3x128xf32, #tpu.memory_space<vmem>>, vector<1x1x1x128xf32>
      %152 = vector.shape_cast %151 : vector<1x1x1x128xf32> to vector<128xf32>
      %153 = vector.shape_cast %150 : vector<128xf32> to vector<1x1x1x128xf32>
      tpu.vector_store %arg7[%c0_92, %c0_93, %c1_94, %c0_95], %153 {strides = array<i32>} : memref<1x1x3x128xf32, #tpu.memory_space<vmem>>, vector<1x1x1x128xf32>,
      %c2_96 = arith.constant 2 : index
      %c0_97 = arith.constant 0 : index
      %c0_98 = arith.constant 0 : index
      %154 = vector.load %arg8[%c2_96, %c0_97, %c0_98] : memref<3x2x128xf32, #tpu.memory_space<vmem>>, vector<1x2x128xf32>
      %155 = vector.shape_cast %154 : vector<1x2x128xf32> to vector<2x128xf32>
      %cst_99 = arith.constant dense<0.000000e+00> : vector<128xf32>
      %156 = vector.multi_reduction <add>, %155, %cst_99 [0] : vector<2x128xf32> to vector<128xf32>
      %c0_100 = arith.constant 0 : index
      %c0_101 = arith.constant 0 : index
      %c2_102 = arith.constant 2 : index
      %c0_103 = arith.constant 0 : index
      %157 = vector.load %arg7[%c0_100, %c0_101, %c2_102, %c0_103] : memref<1x1x3x128xf32, #tpu.memory_space<vmem>>, vector<1x1x1x128xf32>
      %158 = vector.shape_cast %157 : vector<1x1x1x128xf32> to vector<128xf32>
      %159 = vector.shape_cast %156 : vector<128xf32> to vector<1x1x1x128xf32>
      tpu.vector_store %arg7[%c0_100, %c0_101, %c2_102, %c0_103], %159 {strides = array<i32>} : memref<1x1x3x128xf32, #tpu.memory_space<vmem>>, vector<1x1x1x128xf32>,
    } else {
    }
    return
  }
  func.func @transform_0(%arg0: i32, %arg1: i32, %arg2: i32) -> (i32, i32, i32) {
    %c1_i32 = arith.constant 1 : i32
    %0 = arith.muli %arg1, %c1_i32 : i32
    %1 = arith.addi %0, %arg2 : i32
    %c0_i32 = arith.constant 0 : i32
    %2 = arith.minsi %1, %c0_i32 : i32
    %c0_i32_0 = arith.constant 0 : i32
    %c0_i32_1 = arith.constant 0 : i32
    return %arg0, %2, %c0_i32_0 : i32, i32, i32
  }
  func.func @transform_1(%arg0: i32, %arg1: i32, %arg2: i32) -> (i32, i32, i32, i32) {
    %c1_i32 = arith.constant 1 : i32
    %0 = arith.muli %arg1, %c1_i32 : i32
    %1 = arith.addi %0, %arg2 : i32
    %c0_i32 = arith.constant 0 : i32
    %2 = arith.minsi %1, %c0_i32 : i32
    %c0_i32_0 = arith.constant 0 : i32
    %c0_i32_1 = arith.constant 0 : i32
    %c0_i32_2 = arith.constant 0 : i32
    return %arg0, %c0_i32_0, %2, %c0_i32_1 : i32, i32, i32, i32
  }
  func.func @transform_2(%arg0: i32, %arg1: i32, %arg2: i32) -> (i32, i32, i32, i32) {
    %c1_i32 = arith.constant 1 : i32
    %0 = arith.muli %arg1, %c1_i32 : i32
    %1 = arith.addi %0, %arg2 : i32
    %c0_i32 = arith.constant 0 : i32
    %2 = arith.minsi %1, %c0_i32 : i32
    %c0_i32_0 = arith.constant 0 : i32
    %c0_i32_1 = arith.constant 0 : i32
    %c0_i32_2 = arith.constant 0 : i32
    return %arg0, %c0_i32_0, %2, %c0_i32_1 : i32, i32, i32, i32
  }
  func.func @transform_3(%arg0: i32, %arg1: i32, %arg2: i32) -> (i32, i32, i32, i32) {
    %c1_i32 = arith.constant 1 : i32
    %0 = arith.muli %arg1, %c1_i32 : i32
    %1 = arith.addi %0, %arg2 : i32
    %c0_i32 = arith.constant 0 : i32
    %2 = arith.minsi %1, %c0_i32 : i32
    %c0_i32_0 = arith.constant 0 : i32
    %c0_i32_1 = arith.constant 0 : i32
    %c0_i32_2 = arith.constant 0 : i32
    return %arg0, %c0_i32_0, %2, %c0_i32_1 : i32, i32, i32, i32
  }
  func.func @transform_4(%arg0: i32, %arg1: i32, %arg2: i32) -> (i32, i32, i32, i32) {
    %c0_i32 = arith.constant 0 : i32
    %c0_i32_0 = arith.constant 0 : i32
    %c0_i32_1 = arith.constant 0 : i32
    return %arg0, %arg1, %c0_i32, %c0_i32_0 : i32, i32, i32, i32
  }
}

</mosaic_0001>

<bundles_post_ra>
// kernel: tpu_custom_call.1
= control target key start
LH: loop header
LB: loop body
LE: loop exit
PB: predicated region body
PF: predicated region fallthrough
CT: control target
= control target key end

     0   :  { %s1435_s0 = inlined_call_operand.hbm [shape: s32[2,2,128], index: 0, kind: input, shape index: {}]   ;;  %s1436_s1 = inlined_call_operand.hbm [shape: f32[2,4,2,128], index: 1, kind: input, shape index: {}]   ;;  %s1437_s2 = inlined_call_operand.hbm [shape: f32[2,4,2,128], index: 2, kind: input, shape index: {}]   ;;  %s1438_s3 = inlined_call_operand.hbm [shape: f32[2,4,2,128], index: 3, kind: input, shape index: {}]   ;;  %s1439_s4 = inlined_call_operand.vmem [shape: f32[2,1,3,128], index: 4, kind: output, shape index: {}]  }
   0x1   :  { %1448 = sst [smem:[#allocation13_spill]] %s1436_s1 }
   0x2   :  { %9 = vsyncpa [#allocation4], 0 }
   0x3   :  { %11 = vsyncpa [#allocation4 + $0x1], 0 }
   0x4   :  { %12 = vsyncpa [#allocation6], 0 }
   0x5   :  { %14 = vsyncpa [#allocation6 + $0x1], 0 }
   0x6   :  { %15 = vsyncpa [#allocation9], 0 }
   0x7   :  { %17 = vsyncpa [#allocation9 + $0x1], 0  ;;  %s1088_s15 = smov 0   ;;  %s1090_s16 = smov 0  }
   0x8   :  { %s1092_s17 = smov 0   ;;  %s1094_s18 = smov 0  }
   0x9   :  { %s1096_s19 = smov 0   ;;  %s1098_s20 = smov 0  }
   0xa LB: > { %s1441_s21 = sadd.s32 4294967295, %s1054_s20   ;;  %s42_s22 = sadd.s32 1, %s1050_s19  ;;  %s1054_s20 = sphi %s1098_s20, %s23_s20   ;;  %s1050_s19 = sphi %s1096_s19, %s1465_s19   ;;  %s1046_s18 = sphi %s1094_s18, %s1464_s18   ;;  %s1042_s17 = sphi %s1092_s17, %s1463_s17   ;;  %s1038_s16 = sphi %s1090_s16, %s1462_s16   ;;  %s1034_s15 = sphi %s1088_s15, %s1461_s15  }
   0xb   : > { %p44_p0 = scmp.ge.s32.totalorder %s42_s22, 2  ;;  %s57_s23 = sadd.s32 1, %s1042_s17 }
   0xc   : > { %p64_p1 = scmp.ne.s32.totalorder %s1042_s17, %s1038_s16  ;;  %p65_p2 = scmp.eq.s32.totalorder %s1054_s20, 0 }
   0xd   : > { %s1467_s22 = smov (%p44_p0, %s42_s22), 0  ;;  %p70_p4 = scmp.ne.s32.totalorder %s1038_s16, %s1034_s15 }
   0xe   : > { %p66_p3 = por %p65_p2, %p64_p1  ;;  %s52_s24 = ssub.s32 %s1050_s19, %s1467_s22 }
   0xf   : > { %p71_p5 = scmp.eq.s32.totalorder %s1441_s21, 0  ;;  %p55_p6 = scmp.eq.s32.totalorder %s52_s24, 0 }
  0x10   : > { %p794_p8 = scmp.lt.s32.totalorder %s1054_s20, 2  ;;  %s1138_s27 = sand.u32 1, %s1042_s17  }
  0x11   : > { %p1129_p7 = por %p71_p5, %p70_p4  ;;  %s246_s29 = sand.u32 1, %s1054_s20  }
  0x12   : > { %s1135_s26 = scalar_select %p55_p6, %s1042_s17, %s57_s23  }
  0x13   : > { %s1449_s25 = scalar_select %p1129_p7, 1, 0 }
  0x14   : > { %p1140_p9 = pnand %p794_p8, %p66_p3  ;;  %s1146_s30 = sshll.u32 %s1138_s27, 3 }
  0x15   : > { %s1149_s5 = sshll.u32 %s1050_s19, 7  ;;  %s1451_s1 = sld [smem:[#allocation13_spill]] }
  0x16   : > { %s1450_s28 = scalar_select %p1140_p9, 1, 0 }
  0x17   : > { %s250_s9 = scalar_lea.vmem [#allocation5], %s1146_s30  ;;  %s1161_s11 = scalar_lea.sflag [#allocation6], %s246_s29 }
  0x18   : > { %s261_s10 = sshll.u32 %s250_s9, 4  ;;  %p1167_p12 = pneg %p1140_p9  ;;  %s1158_s10 = int_to_ptr.vmem [resolvable:$true] %s261_s10 }
  0x1b   : > { %s1155_s8 = scalar_lea.hbm %s1451_s1, %s1149_s5  ;;  %s881_s23 = scalar_lea.hbm %s1451_s1, 256 }
  0x1c   : > { %s876_s12 = scalar_lea.hbm %s1155_s8, 128  ;;  %p882_p1 = scmp.lt.u32.totalorder %s1155_s8, %s1451_s1 }
  0x1d   : > { %p877_p11 = scmp.ne.s32.totalorder %s1155_s8, %s876_s12  ;;  %p883_p2 = scmp.lt.u32.totalorder %s881_s23, %s876_s12 }
  0x1e   : > { %p885_p4 = scmp.lt.u32.totalorder %s876_s12, %s1155_s8 }
  0x1f   : > { %p879_p13 = pnand %p1167_p12, %p877_p11  ;;  %p884_p3 = por %p883_p2, %p882_p1 }
  0x21   : > { %p880_p0 = pneg %p879_p13  ;;  %p886_p5 = por %p885_p4, %p884_p3 }
  0x23   : > { %p887_p6 = pnand %p886_p5, %p880_p0 }
  0x25   : > { %890 = shalt.err (!%p887_p6)
}
  0x26   : > { %s891_s29 = scalar_lea.vmem %s1158_s10, 128  ;;  %s1056_s7 = smov [#allocation5]  }
  0x27   : > { %p892_p8 = scmp.ne.s32.totalorder %s1158_s10, %s891_s29  ;;  %s896_s9 = sshll.u32 %s1056_s7, 4  ;;  %s897_s9 = int_to_ptr.vmem [resolvable:$false] %s896_s9 }
  0x28   : > { %s898_s14 = scalar_lea.vmem %s897_s9, 256  ;;  %p899_p10 = scmp.lt.s32.totalorder %s1158_s10, %s897_s9 }
  0x29   : > { %p894_p11 = pnand %p892_p8, %p1167_p12  ;;  %p900_p7 = scmp.lt.s32.totalorder %s898_s14, %s891_s29 }
  0x2b   : > { %p895_p13 = pneg %p894_p11  ;;  %p901_p1 = por %p900_p7, %p899_p10 }
  0x2d   : > { %p902_p2 = pnand %p901_p1, %p895_p13 }
  0x2f   : > { %905 = shalt.err (!%p902_p2)
}
  0x30   : > { %s1442_s12 = smov 32   ;;  %s1444_s15 = smov 2  }
  0x31   : > { %787 = dma.hbm_to_vmem [thread:$0]  (!%p1140_p9), %s1155_s8, 128, %s1158_s10, %s1161_s11, %s1442_s12, %s1442_s12, %s1444_s15  }
  0x32   : > { %p319_p7 = scmp.lt.s32.totalorder %s1054_s20, 3  ;;  %p1453_p10 = scmp.ge.s32.totalorder %s1054_s20, 1 }
  0x33   : > { %s742_s24 = sshll.u32 %s1138_s27, 1  ;;  %s743_s6 = sshll.u32 %s1050_s19, 5 }
  0x34   : > { %p1197_p0 = pnand %p1453_p10, %p319_p7  ;;  %s1206_s9 = scalar_lea.hbm %s1435_s0, %s743_s6 }
  0x35   : > { %s228_s14 = scalar_lea.vmem [#allocation3], %s742_s24  ;;  %s225_s8 = scalar_lea.sflag [#allocation4], %s1138_s27 }
  0x36   : > { %s1454_s23 = scalar_select %p1197_p0, 1, 0 }
  0x37   : > { %s239_s21 = sshll.u32 %s228_s14, 4  ;;  %s906_s10 = scalar_lea.hbm %s1206_s9, 32  ;;  %s240_s21 = int_to_ptr.vmem [resolvable:$true] %s239_s21 }
  0x38   : > { %p907_p3 = scmp.ne.s32.totalorder %s1206_s9, %s906_s10  ;;  %s911_s1 = scalar_lea.hbm %s1435_s0, 64 }
  0x39   : > { %p912_p6 = scmp.lt.u32.totalorder %s1206_s9, %s1435_s0  ;;  %p913_p8 = scmp.lt.u32.totalorder %s911_s1, %s906_s10 }
  0x3a   : > { %p909_p4 = pnand %p907_p3, %p1167_p12  ;;  %p915_p13 = scmp.lt.u32.totalorder %s906_s10, %s1206_s9 }
  0x3b   : > { %p914_p11 = por %p913_p8, %p912_p6 }
  0x3c   : > { %p910_p5 = pneg %p909_p4 }
  0x3d   : > { %p916_p1 = por %p915_p13, %p914_p11 }
  0x3f   : > { %p917_p2 = pnand %p916_p1, %p910_p5 }
  0x41   : > { %920 = shalt.err (!%p917_p2)
}
  0x42   : > { %s921_s24 = scalar_lea.vmem %s240_s21, 32  ;;  %s1059_s7 = smov [#allocation3]  }
  0x43   : > { %p922_p7 = scmp.ne.s32.totalorder %s240_s21, %s921_s24  ;;  %s926_s14 = sshll.u32 %s1059_s7, 4  ;;  %s927_s14 = int_to_ptr.vmem [resolvable:$false] %s926_s14 }
  0x44   : > { %s928_s12 = scalar_lea.vmem %s927_s14, 64  ;;  %p929_p4 = scmp.lt.s32.totalorder %s240_s21, %s927_s14 }
  0x45   : > { %p924_p10 = pnand %p922_p7, %p1167_p12  ;;  %p930_p0 = scmp.lt.s32.totalorder %s928_s12, %s921_s24 }
  0x47   : > { %p925_p3 = pneg %p924_p10  ;;  %p931_p9 = por %p930_p0, %p929_p4 }
  0x49   : > { %p932_p6 = pnand %p931_p9, %p925_p3 }
  0x4b   : > { %935 = shalt.err (!%p932_p6)
}
  0x4c   : > { %p1455_p8 = scmp.ne.s32.totalorder %s1450_s28, 0  ;;  %s1230_s10 = scalar_lea.hbm %s1437_s2, %s1149_s5 }
  0x4d   : > { %s275_s29 = scalar_lea.vmem [#allocation7], %s1146_s30  ;;  %s936_s24 = scalar_lea.hbm %s1230_s10, 128 }
  0x4e   : > { %784 = dma.hbm_to_vmem [thread:$0]  (!%p1455_p8), %s1206_s9, 32, %s240_s21, %s225_s8  }
  0x4f   : > { %s286_s6 = sshll.u32 %s275_s29, 4  ;;  %p937_p9 = scmp.ne.s32.totalorder %s1230_s10, %s936_s24  ;;  %s1233_s6 = int_to_ptr.vmem [resolvable:$true] %s286_s6 }
  0x50   : > { %s941_s9 = scalar_lea.hbm %s1437_s2, 256  ;;  %p942_p11 = scmp.lt.u32.totalorder %s1230_s10, %s1437_s2 }
  0x51   : > { %p939_p0 = pnand %p937_p9, %p1167_p12  ;;  %p943_p13 = scmp.lt.u32.totalorder %s941_s9, %s936_s24 }
  0x52   : > { %p945_p2 = scmp.lt.u32.totalorder %s936_s24, %s1230_s10 }
  0x53   : > { %p940_p5 = pneg %p939_p0  ;;  %p944_p1 = por %p943_p13, %p942_p11 }
  0x55   : > { %p946_p7 = por %p945_p2, %p944_p1 }
  0x57   : > { %p947_p10 = pnand %p946_p7, %p940_p5 }
  0x59   : > { %950 = shalt.err (!%p947_p10)
}
  0x5a   : > { %s951_s12 = scalar_lea.vmem %s1233_s6, 128  ;;  %s1060_s1 = smov [#allocation7]  }
  0x5b   : > { %p952_p3 = scmp.ne.s32.totalorder %s1233_s6, %s951_s12  ;;  %s956_s15 = sshll.u32 %s1060_s1, 4  ;;  %s957_s15 = int_to_ptr.vmem [resolvable:$false] %s956_s15 }
  0x5c   : > { %s958_s29 = scalar_lea.vmem %s957_s15, 256  ;;  %p959_p9 = scmp.lt.s32.totalorder %s1233_s6, %s957_s15 }
  0x5d   : > { %p954_p4 = pnand %p952_p3, %p1167_p12  ;;  %p960_p0 = scmp.lt.s32.totalorder %s958_s29, %s951_s12 }
  0x5f   : > { %p955_p6 = pneg %p954_p4  ;;  %p961_p11 = por %p960_p0, %p959_p9 }
  0x61   : > { %p962_p13 = pnand %p961_p11, %p955_p6 }
  0x63   : > { %965 = shalt.err (!%p962_p13)
}
  0x64   : > { %s1456_s24 = smov 2   ;;  %s1457_s7 = smov 32  }
  0x65   : > { %790 = dma.hbm_to_vmem [thread:$0]  (!%p1455_p8), %s1230_s10, 128, %s1233_s6, %s1161_s11, %s1457_s7, %s1457_s7, %s1456_s24  }
  0x66   : > { %s1264_s8 = scalar_lea.hbm %s1438_s3, %s1149_s5  ;;  %s300_s14 = scalar_lea.vmem [#allocation8], %s1146_s30 }
  0x67   : > { %s311_s12 = sshll.u32 %s300_s14, 4  ;;  %s297_s1 = scalar_lea.sflag [#allocation9], %s1138_s27  ;;  %s1267_s12 = int_to_ptr.vmem [resolvable:$true] %s311_s12 }
  0x68   : > { %s966_s15 = scalar_lea.hbm %s1264_s8, 128  ;;  %s971_s6 = scalar_lea.hbm %s1438_s3, 256 }
  0x69   : > { %p967_p5 = scmp.ne.s32.totalorder %s1264_s8, %s966_s15  ;;  %p972_p7 = scmp.lt.u32.totalorder %s1264_s8, %s1438_s3 }
  0x6a   : > { %p973_p10 = scmp.lt.u32.totalorder %s971_s6, %s966_s15  ;;  %p975_p4 = scmp.lt.u32.totalorder %s966_s15, %s1264_s8 }
  0x6b   : > { %p969_p1 = pnand %p967_p5, %p1167_p12 }
  0x6c   : > { %p974_p3 = por %p973_p10, %p972_p7 }
  0x6d   : > { %p970_p2 = pneg %p969_p1 }
  0x6e   : > { %p976_p6 = por %p975_p4, %p974_p3 }
  0x70   : > { %p977_p9 = pnand %p976_p6, %p970_p2 }
  0x72   : > { %980 = shalt.err (!%p977_p9)
}
  0x73   : > { %s981_s30 = scalar_lea.vmem %s1267_s12, 128  ;;  %s1061_s21 = smov [#allocation8]  }
  0x74   : > { %p982_p0 = scmp.ne.s32.totalorder %s1267_s12, %s981_s30  ;;  %s986_s9 = sshll.u32 %s1061_s21, 4  ;;  %s987_s9 = int_to_ptr.vmem [resolvable:$false] %s986_s9 }
  0x75   : > { %s988_s14 = scalar_lea.vmem %s987_s9, 256  ;;  %p989_p5 = scmp.lt.s32.totalorder %s1267_s12, %s987_s9 }
  0x76   : > { %p984_p11 = pnand %p982_p0, %p1167_p12  ;;  %p990_p1 = scmp.lt.s32.totalorder %s988_s14, %s981_s30 }
  0x78   : > { %p985_p13 = pneg %p984_p11  ;;  %p991_p7 = por %p990_p1, %p989_p5 }
  0x7a   : > { %p992_p10 = pnand %p991_p7, %p985_p13 }
  0x7c   : > { %995 = shalt.err (!%p992_p10)
}
  0x7d   : > { %793 = dma.hbm_to_vmem [thread:$0]  (!%p1455_p8), %s1264_s8, 128, %s1267_s12, %s297_s1, %s1457_s7, %s1457_s7, %s1456_s24  }
  0x7e   : > { %p1458_p12 = scmp.ne.s32.totalorder %s1454_s23, 0 }
  0x7f   : > { %s325_s13 = sand.u32 (!%p1458_p12), 1, %s1038_s16   ;;  %p1459_p2 = scmp.ne.s32.totalorder (!%p1458_p12), %s1449_s25, 0 }
  0x80   : > { %323 = sbr.rel (%p1458_p12) target bundleno = 221 (0xdd), region = 36  ;;  %s754_s15 = sshll.u32 (!%p1458_p12), %s325_s13, 1 }
  0x81   : > { %s326_s11 = scalar_lea.sflag (!%p1458_p12), [#allocation4], %s325_s13  ;;  %s1299_s10 = scalar_lea.vmem (!%p1458_p12), [#allocation3], %s754_s15 }
  0x87   : > { %1021 = dma.done.wait (%p1459_p2), %s326_s11, 32  }
  0x88   : > { %1023 = vsyncadd (%p1459_p2), %s326_s11, 4294967264  ;;  %s1460_s27 = sadd.s32 4294967295, %s1054_s20   ;;  %s755_s24 = sshll.u32 %s325_s13, 3 }
  0x89   : > { %s334_s28 = sand.u32 1, %s1460_s27   ;;  %s338_s23 = scalar_lea.vmem [#allocation5], %s755_s24 }
  0x8a   : > { %s335_s7 = scalar_lea.sflag [#allocation6], %s334_s28 }
  0x8b   : > { %1025 = dma.done.wait (%p1459_p2), %s335_s7, 256  }
  0x8c   : > { %1027 = vsyncadd (%p1459_p2), %s335_s7, 4294967040  ;;  %s347_s8 = scalar_lea.vmem [#allocation7], %s755_s24  ;;  %s353_s12 = scalar_lea.sflag [#allocation9], %s325_s13 }
  0x8d   : > { %s356_s1 = scalar_lea.vmem [#allocation8], %s755_s24 }
  0x8e   : > { %1029 = dma.done.wait (%p1459_p2), %s353_s12, 128  }
  0x8f   : > { %1031 = vsyncadd (%p1459_p2), %s353_s12, 4294967168  ;;  %v1062_v0 = vmov 0.0   ;;  %v1315_v1 = vld [vmem:[%s338_s23] sm:$0x3]  ;;  %v1317_v2 = vld [vmem:[%s338_s23 + $0x2] sm:$0x3] }
  0x90   : > { %421 = vst [vmem:[#allocation2] sm:$0x3] %v1062_v0  ;;  %422 = vst [vmem:[#allocation2 + $0x2] sm:$0x3] %v1062_v0  ;;  %v1319_v3 = vld [vmem:[%s338_s23 + $0x4] sm:$0x3]  ;;  %v436_v4 = vmax.f32 %v1315_v1, %v1317_v2 }
  0x91   : > { %423 = vst [vmem:[#allocation2 + $0x4] sm:$0x3] %v1062_v0  ;;  %v1323_v5 = vld [vmem:[%s338_s23 + $0x6] sm:$0x3]  ;;  %v1325_v6 = vld [vmem:[%s347_s8] sm:$0x3] }
  0x92   : > { %v437_v7 = vmax.f32 %v436_v4, %v1319_v3  ;;  %v1328_v8 = vld [vmem:[%s347_s8 + $0x2] sm:$0x3]  ;;  %v1330_v9 = vld [vmem:[%s347_s8 + $0x4] sm:$0x3]  ;;  %v1334_v11 = vld [vmem:[%s356_s1] sm:$0x3] }
  0x93   : > { %v472_v10 = vmax.f32 %v1325_v6, %v1328_v8  ;;  %v1339_v13 = vld [vmem:[%s347_s8 + $0x6] sm:$0x3]  ;;  %v1341_v14 = vld [vmem:[%s356_s1 + $0x2] sm:$0x3]  ;;  %v1343_v15 = vld [vmem:[%s356_s1 + $0x4] sm:$0x3] }
  0x94   : > { %v1337_v12 = vmax.f32 %v437_v7, %v1323_v5  ;;  %v508_v17 = vmax.f32 %v1334_v11, %v1341_v14  ;;  %v1359_v23 = vld [vmem:[%s356_s1 + $0x6] sm:$0x3]  ;;  %v424_v49 = vld [vmem:[%s1299_s10] sm:$0x3]  ;;  %vm552_vm4 = vcmask 1041408   ;;  %p410_p8 = scmp.lt.s32.totalorder %s1046_s18, 1 }
  0x95   : > { %v473_v16 = vmax.f32 %v472_v10, %v1330_v9  ;;  %vm425_vm0 = vcmp.eq.s32.totalorder %v424_v49, 0  ;;  %vm426_vm1 = vcmp.eq.s32.totalorder %v424_v49, 1  ;;  %vm427_vm2 = vcmp.eq.s32.totalorder %v424_v49, 2 }
  0x96   : > { %v439_v18 = vsub.f32 %v1315_v1, %v1337_v12  ;;  %v443_v19 = vsub.f32 %v1317_v2, %v1337_v12  ;;  %v449_v20 = vsub.f32 %v1319_v3, %v1337_v12  ;;  %v455_v21 = vsub.f32 %v1323_v5, %v1337_v12  ;;  %s1469_s18 = smov (!%p410_p8, %s1046_s18), 1 }
  0x97   : > { %v1357_v22 = vmax.f32 %v473_v16, %v1339_v13  ;;  %v509_v24 = vmax.f32 %v508_v17, %v1343_v15  ;;  %v442_v60 = vsel %vm425_vm0, %v1315_v1, 0.0  ;;  %v447_v61 = vsel %vm426_vm1, %v1317_v2, 0.0  ;;  %s758_s25 = sshll.u32 %s1469_s18, 2 }
  0x98   : > { %v440_v25 = vmul.f32 1.442695, %v439_v18  ;;  %v444_v26 = vmul.f32 1.442695, %v443_v19  ;;  %v450_v27 = vmul.f32 1.442695, %v449_v20  ;;  %v448_v16 = vadd.f32 %v447_v61, %v442_v60  ;;  %s416_s29 = scalar_lea.vmem %s1439_s4, %s758_s25 }
  0x99   : > { %v456_v28 = vmul.f32 1.442695, %v455_v21  ;;  %v475_v29 = vsub.f32 %v1325_v6, %v1357_v22  ;;  %v479_v30 = vsub.f32 %v1328_v8, %v1357_v22  ;;  %v485_v31 = vsub.f32 %v1330_v9, %v1357_v22 }
  0x9a   : > { %846 = vpow2.f32 %v440_v25  ;;  %v491_v32 = vsub.f32 %v1339_v13, %v1357_v22  ;;  %v1371_v33 = vmax.f32 %v509_v24, %v1359_v23  ;;  %vm428_vm3 = vcmp.eq.s32.totalorder %v424_v49, 3 }
  0x9b   : > { %848 = vpow2.f32 %v444_v26  ;;  %v476_v34 = vmul.f32 1.442695, %v475_v29  ;;  %v480_v35 = vmul.f32 1.442695, %v479_v30  ;;  %v486_v36 = vmul.f32 1.442695, %v485_v31 }
  0x9c   : > { %850 = vpow2.f32 %v450_v27  ;;  %v511_v37 = vsub.f32 %v1334_v11, %v1371_v33  ;;  %v515_v38 = vsub.f32 %v1341_v14, %v1371_v33  ;;  %v492_v39 = vmul.f32 1.442695, %v491_v32  ;;  %v537_v32 = vld [vmem:[#allocation2] sm:$0x3] }
  0x9d   : > { %852 = vpow2.f32 %v456_v28  ;;  %v521_v40 = vsub.f32 %v1343_v15, %v1371_v33  ;;  %v527_v41 = vsub.f32 %v1359_v23, %v1371_v33  ;;  %v453_v17 = vsel %vm427_vm2, %v1319_v3, 0.0 }
  0x9e   : > { %854 = vpow2.f32 %v476_v34  ;;  %v512_v42 = vmul.f32 1.442695, %v511_v37  ;;  %v516_v43 = vmul.f32 1.442695, %v515_v38  ;;  %v478_v18 = vsel %vm425_vm0, %v1325_v6, 0.0 }
  0x9f   : > { %856 = vpow2.f32 %v480_v35  ;;  %v522_v44 = vmul.f32 1.442695, %v521_v40  ;;  %v528_v45 = vmul.f32 1.442695, %v527_v41  ;;  %v483_v1 = vsel %vm426_vm1, %v1328_v8, 0.0 }
  0xa0   : > { %858 = vpow2.f32 %v486_v36  ;;  %v454_v20 = vadd.f32 %v453_v17, %v448_v16  ;;  %v459_v21 = vsel %vm428_vm3, %v1323_v5, 0.0  ;;  %v484_v24 = vadd.f32 %v483_v1, %v478_v18 }
  0xa1   : > { %860 = vpow2.f32 %v492_v39  ;;  %v489_v25 = vsel %vm427_vm2, %v1330_v9, 0.0  ;;  %v514_v3 = vsel %vm425_vm0, %v1334_v11, 0.0  ;;  %v519_v6 = vsel %vm426_vm1, %v1341_v14, 0.0 }
  0xa2   : > { %862 = vpow2.f32 %v512_v42  ;;  %v460_v8 = vadd.f32 %v459_v21, %v454_v20  ;;  %v490_v28 = vadd.f32 %v489_v25, %v484_v24  ;;  %v520_v29 = vadd.f32 %v519_v6, %v514_v3 }
  0xa3   : > { %864 = vpow2.f32 %v516_v43  ;;  %v495_v30 = vsel %vm428_vm3, %v1339_v13, 0.0  ;;  %v525_v5 = vsel %vm427_vm2, %v1343_v15, 0.0  ;;  %v531_v36 = vsel %vm428_vm3, %v1359_v23, 0.0  ;;  %v541_v13 = vld [vmem:[#allocation2 + $0x2] sm:$0x3] }
  0xa4   : > { %v847_v46 = vpop.eup %846  ;;  %866 = vpow2.f32 %v522_v44  ;;  %v496_v34 = vadd.f32 %v495_v30, %v490_v28  ;;  %v526_v14 = vadd.f32 %v525_v5, %v520_v29  ;;  %v545_v43 = vld [vmem:[#allocation2 + $0x4] sm:$0x3] }
  0xa5   : > { %v849_v47 = vpop.eup %848  ;;  %868 = vpow2.f32 %v528_v45 }
  0xa6   : > { %v851_v48 = vpop.eup %850  ;;  %v446_v50 = vadd.f32 %v849_v47, %v847_v46  ;;  %v532_v40 = vadd.f32 %v531_v36, %v526_v14 }
  0xa7   : > { %v853_v51 = vpop.eup %852 }
  0xa8   : > { %v855_v52 = vpop.eup %854  ;;  %v452_v53 = vadd.f32 %v851_v48, %v446_v50 }
  0xa9   : > { %v857_v54 = vpop.eup %856 }
  0xaa   : > { %v859_v55 = vpop.eup %858  ;;  %v458_v56 = vadd.f32 %v853_v51, %v452_v53  ;;  %v482_v57 = vadd.f32 %v857_v54, %v855_v52 }
  0xab   : > { %v861_v58 = vpop.eup %860 }
  0xac   : > { %v863_v59 = vpop.eup %862  ;;  %870 = vlog2.f32 %v458_v56  ;;  %v488_v62 = vadd.f32 %v859_v55, %v482_v57 }
  0xad   : > { %v865_v63 = vpop.eup %864 }
  0xae   : > { %v867_v0 = vpop.eup %866  ;;  %v494_v4 = vadd.f32 %v861_v58, %v488_v62  ;;  %v518_v7 = vadd.f32 %v865_v63, %v863_v59 }
  0xaf   : > { %v869_v10 = vpop.eup %868 }
  0xb0   : > { %872 = vlog2.f32 %v494_v4  ;;  %v524_v2 = vadd.f32 %v867_v0, %v518_v7 }
  0xb2   : > { %v530_v19 = vadd.f32 %v869_v10, %v524_v2 }
  0xb4   : > { %874 = vlog2.f32 %v530_v19 }
  0xb6   : > { %v871_v26 = vpop.eup %870 }
  0xb7   : > { %v462_v27 = vmul.f32 0.6931472, %v871_v26 }
  0xb9   : > { %v463_v9 = vadd.f32 %v462_v27, %v1337_v12 }
  0xba   : > { %v873_v31 = vpop.eup %872 }
  0xbb   : > { %v464_v11 = vsub.f32 %v463_v9, %v460_v8  ;;  %v498_v35 = vmul.f32 0.6931472, %v873_v31 }
  0xbd   : > { %v538_v37 = vadd.f32 %v537_v32, %v464_v11  ;;  %v499_v38 = vadd.f32 %v498_v35, %v1357_v22 }
  0xbe   : > { %v875_v39 = vpop.eup %874 }
  0xbf   : > { %539 = vst [vmem:[#allocation2] sm:$0x3] %v538_v37  ;;  %v500_v15 = vsub.f32 %v499_v38, %v496_v34  ;;  %v534_v12 = vmul.f32 0.6931472, %v875_v39 }
  0xc1   : > { %v542_v41 = vadd.f32 %v541_v13, %v500_v15  ;;  %v535_v42 = vadd.f32 %v534_v12, %v1371_v33 }
  0xc3   : > { %543 = vst [vmem:[#allocation2 + $0x2] sm:$0x3] %v542_v41  ;;  %v536_v44 = vsub.f32 %v535_v42, %v532_v40 }
  0xc5   : > { %v546_v45 = vadd.f32 %v545_v43, %v536_v44 }
  0xc6   : > { %v551_v23 = vld [vmem:[#allocation2] sm:$0x3] }
  0xc7   : > { %547 = vst [vmem:[#allocation2 + $0x4] sm:$0x3] %v546_v45  ;;  %v553_v22 = vsel %vm552_vm4, %v551_v23, 0.0 }
  0xc8   : > { %v554_v46 = vrot.slane %v553_v22, 4 }
  0xca   : > { %v555_v47 = vadd.f32 %v554_v46, %v553_v22  ;;  %v561_v48 = vld [vmem:[#allocation2 + $0x2] sm:$0x3] }
  0xcb   : > { %v562_v49 = vsel %vm552_vm4, %v561_v48, 0.0 }
  0xcc   : > { %v556_v50 = vrot.slane %v555_v47, 2  ;;  %v563_v51 = vrot.slane %v562_v49, 4 }
  0xce   : > { %v557_v33 = vadd.f32 %v556_v50, %v555_v47  ;;  %v564_v52 = vadd.f32 %v563_v51, %v562_v49  ;;  %v570_v53 = vld [vmem:[#allocation2 + $0x4] sm:$0x3] }
  0xcf   : > { %v571_v54 = vsel %vm552_vm4, %v570_v53, 0.0 }
  0xd0   : > { %v558_v55 = vrot.slane %v557_v33, 1  ;;  %v565_v56 = vrot.slane %v564_v52, 2  ;;  %v572_v57 = vrot.slane %v571_v54, 4 }
  0xd2   : > { %v559_v58 = vadd.f32 %v558_v55, %v557_v33  ;;  %v566_v59 = vadd.f32 %v565_v56, %v564_v52  ;;  %v573_v60 = vadd.f32 %v572_v57, %v571_v54 }
  0xd4   : > { %560 = vst [vmem:[%s416_s29] sm:$0x1] %v559_v58  ;;  %v567_v61 = vrot.slane %v566_v59, 1  ;;  %v574_v62 = vrot.slane %v573_v60, 2 }
  0xd6   : > { %v568_v63 = vadd.f32 %v567_v61, %v566_v59  ;;  %v575_v0 = vadd.f32 %v574_v62, %v573_v60 }
  0xd8   : > { %569 = vst [vmem:[%s416_s29 + $0x1] sm:$0x1] %v568_v63  ;;  %v576_v4 = vrot.slane %v575_v0, 1 }
  0xda   : > { %v577_v7 = vadd.f32 %v576_v4, %v575_v0 }
  0xdc   : > { %578 = vst [vmem:[%s416_s29 + $0x2] sm:$0x1] %v577_v7 }
  0xdd PF: > { %s23_s20 = sadd.s32 1, %s1054_s20   ;;  %s1461_s15 = smov %s1038_s16 }
  0xde   : > { %p20_p3 = scmp.ge.s32.totalorder %s23_s20, 4   ;;  %s1462_s16 = smov %s1042_s17 }
  0xdf   : > { %s1463_s17 = smov %s1135_s26  ;;  %s1464_s18 = smov %s1050_s19 }
  0xe0   : > { %s1465_s19 = smov %s1467_s22  ;;  %22 = sbr.rel (!%p20_p3) target bundleno = 10 (0xa), region = 132 }
  0xe7   :  { %604 = vsyncpa [#allocation4], 1 }
  0xe8   :  { %606 = vsyncpa [#allocation4 + $0x1], 1 }
  0xe9   :  { %607 = vsyncpa [#allocation6], 1 }
  0xea   :  { %609 = vsyncpa [#allocation6 + $0x1], 1 }
  0xeb   :  { %610 = vsyncpa [#allocation9], 1 }
  0xec   :  { %612 = vsyncpa [#allocation9 + $0x1], 1 }

</bundles_post_ra>
